<compile_context>
chip_gen: v5e
topology: v5e:2x2
jax: 0.10.0
libtpu: 0.0.40
codegen_flags: <defaults>
</compile_context>

<pallas_src>
import functools

import jax
import jax.numpy as jnp
from jax import lax
from jax.experimental import pallas as pl
from jax.experimental.pallas import tpu as pltpu

OUT_DIM = 3      # fixed by the module: nn.Linear(hidden_size, 3)
OUT_PAD = 8      # sublane-aligned padded output width (>= OUT_DIM)


def neuronet1_kernel(x_ref, w1_ref, b1_ref, w2_ref, b2_ref, o_ref):
    # Cast x to bf16 in-kernel (cheap VPU work hidden under DMA).
    x = x_ref[...].astype(jnp.bfloat16)

    # linear1: x (TB, in) bf16  X  w1 (hidden, in) bf16, contract the `in` axis
    # -> (TB, hidden) f32 accumulation on the MXU (no weight transpose needed).
    h = lax.dot_general(
        x, w1_ref[...],
        dimension_numbers=(((1,), (1,)), ((), ())),
        preferred_element_type=jnp.float32,
    )
    # bias + ReLU in f32 (v5e-safe).
    h = jnp.maximum(h + b1_ref[...], 0.0)

    # linear2: h (TB, hidden) bf16  X  w2_pad (8, hidden) bf16, contract `hidden`
    # -> (TB, 8) f32 (small padded output block).
    out = lax.dot_general(
        h.astype(jnp.bfloat16), w2_ref[...],
        dimension_numbers=(((1,), (1,)), ((), ())),
        preferred_element_type=jnp.float32,
    )
    out = out + b2_ref[...]
    o_ref[...] = jax.nn.sigmoid(out).astype(o_ref.dtype)


def prepare_params(w1, b1, w2, b2):
    """One-time weight packing (hoisted out of the per-call forward).

    w1: (hidden, input_size) PyTorch layout, b1: (hidden,)
    w2: (3, hidden)          PyTorch layout, b2: (3,)
    """
    hidden = w1.shape[0]
    w1_bf = w1.astype(jnp.bfloat16)
    b1_2d = b1.reshape(1, hidden).astype(jnp.float32)
    w2_pad = jnp.zeros((OUT_PAD, hidden), jnp.bfloat16).at[:OUT_DIM].set(
        w2.astype(jnp.bfloat16))
    b2_pad = jnp.zeros((1, OUT_PAD), jnp.float32).at[0, :OUT_DIM].set(
        b2.astype(jnp.float32))
    return (w1_bf, b1_2d, w2_pad, b2_pad)


def _choose_tb(batch, block_batch):
    """Batch tile: multiple of 8 when tiled; >=2 grid steps when B >= 16
    so v7x's two TensorCores both get work (harmless ~0.35us on v5e/v6e)."""
    if batch <= 8:
        return batch
    half = -(-batch // 2)              # ceil(B / 2)
    half = ((half + 7) // 8) * 8       # round up to multiple of 8
    return max(8, min(block_batch, half))


@functools.partial(jax.jit, static_argnames=("tb",))
def _neuronet1_forward_impl(x, w1_bf, b1_2d, w2_pad, b2_pad, *, tb):
    B, in_dim = x.shape
    hidden = w1_bf.shape[0]

    grid = (pl.cdiv(B, tb),)

    out_padded = pl.pallas_call(
        neuronet1_kernel,
        out_shape=jax.ShapeDtypeStruct((B, OUT_PAD), jnp.float32),
        grid=grid,
        in_specs=[
            pl.BlockSpec((tb, in_dim), lambda i: (i, 0)),       # x: tiled on batch
            pl.BlockSpec((hidden, in_dim), lambda i: (0, 0)),   # w1: resident
            pl.BlockSpec((1, hidden), lambda i: (0, 0)),        # b1: resident
            pl.BlockSpec((OUT_PAD, hidden), lambda i: (0, 0)),  # w2 (padded): resident
            pl.BlockSpec((1, OUT_PAD), lambda i: (0, 0)),       # b2 (padded): resident
        ],
        out_specs=pl.BlockSpec((tb, OUT_PAD), lambda i: (i, 0)),
        compiler_params=pltpu.CompilerParams(
            dimension_semantics=("parallel",),
        ),
    )(x, w1_bf, b1_2d, w2_pad, b2_pad)

    # Padded lanes hold sigmoid(0) = 0.5 garbage; drop them here.
    return out_padded[:, :OUT_DIM]


def neuronet1_forward(x, params, *, block_batch=2048):
    """x: (B, input_size) f32; params: output of prepare_params().
    Returns sigmoid(relu(x @ w1.T + b1) @ w2.T + b2), shape (B, 3), f32."""
    assert block_batch % 8 == 0, "block_batch must be a multiple of 8"
    tb = _choose_tb(x.shape[0], block_batch)
    return _neuronet1_forward_impl(x, *params, tb=tb)


def reference_forward_f32(x, w1, b1, w2, b2):
    h = jnp.maximum(x @ w1.T + b1, 0.0)
    return jax.nn.sigmoid(h @ w2.T + b2)


def reference_forward_bf16(x, w1, b1, w2, b2):
    # Mirrors the kernel's numerics (bf16 MXU inputs, f32 accumulation/elementwise).
    h = jnp.dot(x.astype(jnp.bfloat16), w1.astype(jnp.bfloat16).T,
                preferred_element_type=jnp.float32) + b1
    h = jnp.maximum(h, 0.0)
    o = jnp.dot(h.astype(jnp.bfloat16), w2.astype(jnp.bfloat16).T,
                preferred_element_type=jnp.float32) + b2
    return jax.nn.sigmoid(o)


if __name__ == "__main__":
    key = jax.random.PRNGKey(0)
    batch = 8
    input_size = 16
    hidden_size = 32

    kx, k1, k2, k3, k4 = jax.random.split(key, 5)

    x = jax.random.normal(kx, (batch, input_size), dtype=jnp.float32)
    lim1 = 1.0 / jnp.sqrt(input_size)
    w1 = jax.random.uniform(k1, (hidden_size, input_size), jnp.float32, -lim1, lim1)
    b1 = jax.random.uniform(k2, (hidden_size,), jnp.float32, -lim1, lim1)
    lim2 = 1.0 / jnp.sqrt(hidden_size)
    w2 = jax.random.uniform(k3, (OUT_DIM, hidden_size), jnp.float32, -lim2, lim2)
    b2 = jax.random.uniform(k4, (OUT_DIM,), jnp.float32, -lim2, lim2)

    params = prepare_params(w1, b1, w2, b2)

    # Single-tile case (B=8, grid=(1,)).
    y = neuronet1_forward(x, params)
    jax.block_until_ready(y)
    assert y.shape == (batch, OUT_DIM)

    y_bf16_ref = reference_forward_bf16(x, w1, b1, w2, b2)
    assert jnp.allclose(y, y_bf16_ref, atol=1e-4, rtol=1e-4)

    y_f32_ref = reference_forward_f32(x, w1, b1, w2, b2)
    assert jnp.allclose(y, y_f32_ref, atol=3e-2, rtol=3e-2)

    # Multi-tile case with a partial last block (B=40 -> tb=24, grid=2).
    x2 = jax.random.normal(jax.random.PRNGKey(1), (40, input_size), jnp.float32)
    y2 = neuronet1_forward(x2, params)
    jax.block_until_ready(y2)
    assert y2.shape == (40, OUT_DIM)
    assert jnp.allclose(y2, reference_forward_bf16(x2, w1, b1, w2, b2),
                        atol=1e-4, rtol=1e-4)

    print("KERNEL_OK")
</pallas_src>

<mosaic_0001>
module attributes {stable_mosaic.version = 11 : i64} {
  func.func @neuronet1_kernel(%arg0: i32, %arg1: memref<8x16xf32, #tpu.memory_space<vmem>>, %arg2: memref<32x16xbf16, #tpu.memory_space<vmem>>, %arg3: memref<1x32xf32, #tpu.memory_space<vmem>>, %arg4: memref<8x32xbf16, #tpu.memory_space<vmem>>, %arg5: memref<1x8xf32, #tpu.memory_space<vmem>>, %arg6: memref<8x8xf32, #tpu.memory_space<vmem>>) attributes {dimension_semantics = [#tpu.dimension_semantics<parallel>], iteration_bounds = array<i64: 1>, scalar_prefetch = 0 : i64, scratch_operands = 0 : i64, tpu.core_type = #tpu.core_type<tc>, window_params = [{transform_indices = @transform_0, window_bounds = array<i64: 8, 16>}, {pipeline_mode = #tpu.pipeline_mode<synchronous>, transform_indices = @transform_1, window_bounds = array<i64: 32, 16>}, {pipeline_mode = #tpu.pipeline_mode<synchronous>, transform_indices = @transform_2, window_bounds = array<i64: 1, 32>}, {pipeline_mode = #tpu.pipeline_mode<synchronous>, transform_indices = @transform_3, window_bounds = array<i64: 8, 32>}, {pipeline_mode = #tpu.pipeline_mode<synchronous>, transform_indices = @transform_4, window_bounds = array<i64: 1, 8>}, {transform_indices = @transform_5, window_bounds = array<i64: 8, 8>}]} {
    %c0 = arith.constant 0 : index
    %c0_0 = arith.constant 0 : index
    %0 = vector.load %arg1[%c0, %c0_0] : memref<8x16xf32, #tpu.memory_space<vmem>>, vector<8x16xf32>
    %1 = arith.truncf %0 : vector<8x16xf32> to vector<8x16xbf16>
    %c0_1 = arith.constant 0 : index
    %c0_2 = arith.constant 0 : index
    %2 = vector.load %arg2[%c0_1, %c0_2] : memref<32x16xbf16, #tpu.memory_space<vmem>>, vector<32x16xbf16>
    %cst = arith.constant dense<0.000000e+00> : vector<8x32xf32>
    %3 = tpu.matmul %1, %2, %cst {dimension_numbers = #tpu.dot_dimension_numbers<[1], [1], [0], [0], [0, 0, 1, 0], [], []>} : vector<8x16xbf16>, vector<32x16xbf16>, vector<8x32xf32> -> vector<8x32xf32>
    %c0_3 = arith.constant 0 : index
    %c0_4 = arith.constant 0 : index
    %4 = vector.load %arg3[%c0_3, %c0_4] : memref<1x32xf32, #tpu.memory_space<vmem>>, vector<1x32xf32>
    %5 = vector.broadcast %4 : vector<1x32xf32> to vector<8x32xf32>
    %6 = arith.addf %3, %5 : vector<8x32xf32>
    %cst_5 = arith.constant 0.000000e+00 : f32
    %7 = vector.broadcast %cst_5 : f32 to vector<8x32xf32>
    %8 = arith.maximumf %6, %7 : vector<8x32xf32>
    %9 = arith.truncf %8 : vector<8x32xf32> to vector<8x32xbf16>
    %c0_6 = arith.constant 0 : index
    %c0_7 = arith.constant 0 : index
    %10 = vector.load %arg4[%c0_6, %c0_7] : memref<8x32xbf16, #tpu.memory_space<vmem>>, vector<8x32xbf16>
    %cst_8 = arith.constant dense<0.000000e+00> : vector<8x8xf32>
    %11 = tpu.matmul %9, %10, %cst_8 {dimension_numbers = #tpu.dot_dimension_numbers<[1], [1], [0], [0], [0, 0, 1, 0], [], []>} : vector<8x32xbf16>, vector<8x32xbf16>, vector<8x8xf32> -> vector<8x8xf32>
    %c0_9 = arith.constant 0 : index
    %c0_10 = arith.constant 0 : index
    %12 = vector.load %arg5[%c0_9, %c0_10] : memref<1x8xf32, #tpu.memory_space<vmem>>, vector<1x8xf32>
    %13 = vector.broadcast %12 : vector<1x8xf32> to vector<8x8xf32>
    %14 = arith.addf %11, %13 : vector<8x8xf32>
    %15 = arith.negf %14 : vector<8x8xf32>
    %16 = math.exp %15 : vector<8x8xf32>
    %cst_11 = arith.constant 1.000000e+00 : f32
    %17 = vector.broadcast %cst_11 : f32 to vector<8x8xf32>
    %18 = arith.addf %17, %16 : vector<8x8xf32>
    %19 = arith.divf %17, %18 : vector<8x8xf32>
    %c0_12 = arith.constant 0 : index
    %c0_13 = arith.constant 0 : index
    %20 = vector.load %arg6[%c0_12, %c0_13] : memref<8x8xf32, #tpu.memory_space<vmem>>, vector<8x8xf32>
    tpu.vector_store %arg6[%c0_12, %c0_13], %19 {strides = array<i32>} : memref<8x8xf32, #tpu.memory_space<vmem>>, vector<8x8xf32>,
    return
  }
  func.func @transform_0(%arg0: i32) -> (i32, i32) {
    %c0_i32 = arith.constant 0 : i32
    %c0_i32_0 = arith.constant 0 : i32
    return %arg0, %c0_i32 : i32, i32
  }
  func.func @transform_1(%arg0: i32) -> (i32, i32) {
    %c0_i32 = arith.constant 0 : i32
    %c0_i32_0 = arith.constant 0 : i32
    %c0_i32_1 = arith.constant 0 : i32
    return %c0_i32, %c0_i32_0 : i32, i32
  }
  func.func @transform_2(%arg0: i32) -> (i32, i32) {
    %c0_i32 = arith.constant 0 : i32
    %c0_i32_0 = arith.constant 0 : i32
    %c0_i32_1 = arith.constant 0 : i32
    return %c0_i32, %c0_i32_0 : i32, i32
  }
  func.func @transform_3(%arg0: i32) -> (i32, i32) {
    %c0_i32 = arith.constant 0 : i32
    %c0_i32_0 = arith.constant 0 : i32
    %c0_i32_1 = arith.constant 0 : i32
    return %c0_i32, %c0_i32_0 : i32, i32
  }
  func.func @transform_4(%arg0: i32) -> (i32, i32) {
    %c0_i32 = arith.constant 0 : i32
    %c0_i32_0 = arith.constant 0 : i32
    %c0_i32_1 = arith.constant 0 : i32
    return %c0_i32, %c0_i32_0 : i32, i32
  }
  func.func @transform_5(%arg0: i32) -> (i32, i32) {
    %c0_i32 = arith.constant 0 : i32
    %c0_i32_0 = arith.constant 0 : i32
    return %arg0, %c0_i32 : i32, i32
  }
}

</mosaic_0001>

<bundles_post_ra>
// kernel: _neuronet1_forward_impl.1
= control target key start
LH: loop header
LB: loop body
LE: loop exit
PB: predicated region body
PF: predicated region fallthrough
CT: control target
= control target key end

     0   :  { %vm41_vm0 = vcmask 130048   ;;  %vm71_vm1 = vcmask 261120   ;;  %vm110_vm5 = vcmask 64512   ;;  %s186_s1 = inlined_call_operand.vmem [shape: bf16[32,16], index: 1, kind: input, shape index: {}]   ;;  %s187_s2 = inlined_call_operand.vmem [shape: f32[1,32], index: 2, kind: input, shape index: {}]   ;;  %s188_s0 = inlined_call_operand.vmem [shape: f32[8,16], index: 0, kind: input, shape index: {}]   ;;  %s189_s4 = inlined_call_operand.vmem [shape: f32[1,8], index: 4, kind: input, shape index: {}]   ;;  %s190_s3 = inlined_call_operand.vmem [shape: bf16[8,32], index: 3, kind: input, shape index: {}]   ;;  %s191_s5 = inlined_call_operand.vmem [shape: f32[8,8], index: 5, kind: output, shape index: {}]  }
   0x1   :  { %v128_v0 = vld [vmem:[%s186_s1 + $0x8] sm:$0xff]  ;;  %v127_v2 = vld [vmem:[%s186_s1] sm:$0xff] }
   0x2   :  { %v49_v1 = vsel %vm41_vm0, %v128_v0, 0  ;;  %v46_v3 = vsel %vm41_vm0, %v127_v2, 0  ;;  %v21_v4 = vld [vmem:[%s188_s0] sm:$0xff] }
   0x3   :  { %57 = vmatpush.bf16.xpose.msra.mxu0 %v49_v1  ;;  %v22_v5 = vpack.c.bf16 %v21_v4, %v21_v4  ;;  %v66_v6 = vld [vmem:[%s190_s3] sm:$0xf] }
   0x4   :  { %v76_v7 = vsel %vm71_vm1, %v66_v6, 0  ;;  %v129_v8 = vld [vmem:[%s187_s2] ss:$0 sm:$0xff] }
   0x5   :  { %85 = vmatpush.bf16.xpose.msra.mxu1 %v76_v7  ;;  %v130_v14 = vld [vmem:[%s189_s4] ss:$0 sm:$0xff] }
   0xb   :  { %58 = vmatpush.bf16.xpose.msra.mxu0 %v46_v3 }
  0x12   :  { %124 = vmatmul.msk.bf16.vlgmr.msra.gmra.mxu0 %vm41_vm0, %v22_v5 }
  0x8f   :  { %v60_v9 = vpop.f32.mrf.mxu0 }
  0x90   :  { %v61_v10 = vadd.f32 %v129_v8, %v60_v9 }
  0x92   :  { %v64_v11 = vmax.f32 %v61_v10, 0.0 }
  0x94   :  { %v65_v12 = vpack.c.bf16 %v64_v11, %v64_v11 }
  0x96   :  { %125 = vmatmul.msk.bf16.vlgmr.msra.gmra.mxu1 %vm71_vm1, %v65_v12 }
  0x97   :  { %v62_v13 = vpop.f32.mrf.mxu0 }
 0x113   :  { %v87_v15 = vpop.f32.mrf.mxu1 }
 0x114   :  { %v88_v16 = vadd.f32 %v130_v14, %v87_v15 }
 0x116   :  { %v126_v17 = vmul.f32 -1.442695, %v88_v16 }
 0x118   :  { %131 = vpow2.f32 %v126_v17 }
 0x11b   :  { %v89_v18 = vpop.f32.mrf.mxu1 }
 0x11e   :  { %v132_v19 = vpop.eup %131 }
 0x11f   :  { %v94_v20 = vadd.f32 1.0, %v132_v19 }
 0x121   :  { %133 = vrcp.f32 %v94_v20  ;;  %v106_v24 = vand.u32 2147483648, %v94_v20  ;;  %v104_v26 = vand.u32 2147483647, %v94_v20  ;;  %vm100_vm3 = vweird.f32 %v94_v20 }
 0x123   :  { %v107_v28 = vor.u32 1.1754944e-38, %v106_v24  ;;  %vm105_vm6 = vcmp.eq.f32.partialorder %v104_v26, 8.507059e+37 }
 0x127   :  { %v134_v21 = vpop.eup %133 }
 0x128   :  { %v96_v22 = vmul.f32 %v134_v21, %v94_v20  ;;  %vm101_vm2 = vweird.f32 %v134_v21 }
 0x129   :  { %vm102_vm4 = vmor %vm100_vm3, %vm101_vm2 }
 0x12a   :  { %v97_v23 = vsub.f32 1.0, %v96_v22 }
 0x12c   :  { %v98_v25 = vmul.f32 %v134_v21, %v97_v23 }
 0x12e   :  { %v99_v27 = vadd.f32 %v134_v21, %v98_v25 }
 0x130   :  { %v103_v29 = vsel %vm102_vm4, %v134_v21, %v99_v27 }
 0x131   :  { %v108_v30 = vsel %vm105_vm6, %v107_v28, %v103_v29 }
 0x132   :  { %111 = vst.msk [vmem:[%s191_s5] sm:$0xff] %vm110_vm5, %v108_v30 }

</bundles_post_ra>
